<compile_context>
chip_gen: v5e
topology: v5e:2x2
jax: 0.10.0
libtpu: 0.0.40
codegen_flags: <defaults>
</compile_context>

<pallas_src>
import functools

import jax
import jax.numpy as jnp
from jax.experimental import pallas as pl
from jax.experimental.pallas import tpu as pltpu


# ---------------------------------------------------------------- kernels ---

def _stats_kernel(x_ref, sum_ref, gram_ref, *, num_groups, spatial, tile_k,
                  steps_half, rows_total):
    """Per-core partial group sums (1,1,G) and symmetric Gram matrix (1,G,G)."""
    G, S = num_groups, spatial
    c = pl.program_id(0)          # TensorCore split ("parallel")
    k = pl.program_id(1)          # reduction over K tiles ("arbitrary")

    @pl.when(k == 0)
    def _():
        sum_ref[...] = jnp.zeros_like(sum_ref)
        gram_ref[...] = jnp.zeros_like(gram_ref)

    # Mask rows past K: covers the cdiv tail block and the fully-out-of-range
    # duplicate block the clamped index_map hands the second core when the
    # number of K tiles is odd.
    step = c * steps_half + k
    row = step * tile_k + jax.lax.broadcasted_iota(jnp.int32, (tile_k, 1), 0)
    x = jnp.where(row < rows_total, x_ref[...].astype(jnp.float32), 0.0)

    xg = [x[:, g * S:(g + 1) * S] for g in range(G)]        # lane slices

    # Per-group sums -> a single (1,1,G) accumulate per grid step.
    sums = [jnp.sum(v).reshape(1, 1) for v in xg]
    sum_ref[...] += jnp.concatenate(sums, axis=1).reshape(1, 1, G)

    # Gram symmetry: only the upper triangle is computed, mirrored in-register,
    # then one (1,G,G) accumulate per grid step (no per-row RMW on the ref).
    # TODO(synk): uncentered E[x x^T] accumulation (centered on the host);
    # for |mean| >> std a centered two-pass accumulation would be safer.
    prod = {}
    for g1 in range(G):
        for g2 in range(g1, G):
            prod[(g1, g2)] = jnp.sum(xg[g1] * xg[g2]).reshape(1, 1)
    gram_rows = []
    for g1 in range(G):
        gram_rows.append(jnp.concatenate(
            [prod[(min(g1, g2), max(g1, g2))] for g2 in range(G)], axis=1))
    gram_ref[...] += jnp.concatenate(gram_rows, axis=0).reshape(1, G, G)


def _whiten_affine_kernel(x_ref, w_ref, b_ref, wm_ref, wmm_ref, o_ref, *,
                          num_groups, spatial):
    """out[:, go*S:(go+1)*S] = w[:,go]*(sum_g wm[go,g]*x_g - wm_mean[go]) + b[:,go]."""
    G, S = num_groups, spatial
    x = x_ref[...].astype(jnp.float32)       # (tile, G*S), dense on lanes
    w = w_ref[...].astype(jnp.float32)       # (tile, G)
    b = b_ref[...].astype(jnp.float32)       # (tile, G)
    outs = []
    for go in range(G):                       # unrolled; G is small
        y = wm_ref[go, 0] * x[:, 0:S]         # wm lives in SMEM -> scalar FMAs
        for gi in range(1, G):
            y = y + wm_ref[go, gi] * x[:, gi * S:(gi + 1) * S]
        outs.append(w[:, go:go + 1] * (y - wmm_ref[go]) + b[:, go:go + 1])
    o_ref[...] = jnp.concatenate(outs, axis=1).astype(o_ref.dtype)


# --------------------------------------------------------------- wrappers ---

def _vmem_budget_bytes():
    """Generation-aware VMEM budget (double-buffered working set) + limit."""
    cap = 128 * 1024 * 1024                   # v5e / v6e physical
    try:
        cap = int(pltpu.get_tpu_info().vmem_capacity_bytes)   # 64 MiB on v7x
    except Exception:
        pass
    budget = int(cap * 0.55)
    limit = min(int(cap * 0.85), 128 * 1024 * 1024)
    return budget, limit


def _pick_tile_k(K, bytes_per_row, budget_bytes):
    """Largest row tile (multiple of 8, or all of K) whose 2x-buffered
    footprint fits the budget.  No divisor-of-K requirement."""
    max_rows = max(1, budget_bytes // (2 * bytes_per_row))
    if max_rows >= K:
        return K
    return min(K, max(8, (max_rows // 8) * 8))


def dbn_stats(x2, num_groups, tile_k, vmem_limit):
    K, GS = x2.shape
    G = num_groups
    S = GS // G
    steps_total = pl.cdiv(K, tile_k)
    steps_half = pl.cdiv(steps_total, 2)      # per-TensorCore share

    kernel = functools.partial(_stats_kernel, num_groups=G, spatial=S,
                               tile_k=tile_k, steps_half=steps_half,
                               rows_total=K)

    def x_map(c, k):
        # Clamp so the DMA window always stays in-bounds; the kernel masks
        # the (logically out-of-range) duplicate block to zero.
        return (jnp.minimum(c * steps_half + k, steps_total - 1), 0)

    sums, gram = pl.pallas_call(
        kernel,
        out_shape=(jax.ShapeDtypeStruct((2, 1, G), jnp.float32),
                   jax.ShapeDtypeStruct((2, G, G), jnp.float32)),
        grid=(2, steps_half),
        in_specs=[pl.BlockSpec((tile_k, GS), x_map)],
        out_specs=(pl.BlockSpec((1, 1, G), lambda c, k: (c, 0, 0)),
                   pl.BlockSpec((1, G, G), lambda c, k: (c, 0, 0))),
        compiler_params=pltpu.CompilerParams(
            dimension_semantics=("parallel", "arbitrary"),
            vmem_limit_bytes=vmem_limit),
    )(x2)
    return sums.sum(axis=0), gram.sum(axis=0)   # (1, G), (G, G)


def dbn_whiten_affine(x2, w_kg, b_kg, wm, wm_mean, tile_k, vmem_limit):
    K, GS = x2.shape
    G = wm.shape[0]
    S = GS // G
    kernel = functools.partial(_whiten_affine_kernel, num_groups=G, spatial=S)
    return pl.pallas_call(
        kernel,
        out_shape=jax.ShapeDtypeStruct((K, GS), x2.dtype),
        grid=(pl.cdiv(K, tile_k),),
        in_specs=[
            pl.BlockSpec((tile_k, GS), lambda i: (i, 0)),
            pl.BlockSpec((tile_k, G), lambda i: (i, 0)),
            pl.BlockSpec((tile_k, G), lambda i: (i, 0)),
            pl.BlockSpec(memory_space=pltpu.MemorySpace.SMEM),   # wm      (G,G)
            pl.BlockSpec(memory_space=pltpu.MemorySpace.SMEM),   # wm@mean (G,)
        ],
        out_specs=pl.BlockSpec((tile_k, GS), lambda i: (i, 0)),
        compiler_params=pltpu.CompilerParams(
            dimension_semantics=("parallel",),
            vmem_limit_bytes=vmem_limit),
    )(x2, w_kg, b_kg, wm, wm_mean)


def dbn_forward(inp, weight, bias, running_mean, running_projection,
                num_groups, eps=1e-5, momentum=0.1, training=True):
    """Mirrors DBN.forward (dim=4, NCHW input, mode=0 & module.training==training)."""
    N, C, H, W = inp.shape
    G = num_groups
    assert C % G == 0
    Cg = C // G
    K = N * Cg
    S = H * W
    M = K * S

    # Zero-copy dense view: x2[k, g*S + s] == input flat element ((k*G+g)*S + s).
    x2 = inp.reshape(K, G * S)

    budget, vmem_limit = _vmem_budget_bytes()
    itemsize = jnp.dtype(inp.dtype).itemsize

    if training:
        stats_bytes_per_row = G * S * (itemsize + 4)          # block + f32 copy
        tile_stats = _pick_tile_k(K, stats_bytes_per_row, budget)
        sum_x, gram = dbn_stats(x2, G, tile_stats, vmem_limit)
        mean = (sum_x / M).reshape(G, 1)
        sigma = gram / M - mean @ mean.T + eps * jnp.eye(G, dtype=jnp.float32)
        # TODO(synk): torch.svd of the GxG covariance has no Pallas equivalent;
        # the tiny GxG eigendecomposition is done with jnp.linalg.eigh
        # (identical to SVD for symmetric PSD sigma).
        eig, u = jnp.linalg.eigh(sigma)
        eig = jnp.maximum(eig, eps)                           # guard tiny negatives
        wm = (u * jax.lax.rsqrt(eig)[None, :]) @ u.T
        new_running_mean = (1.0 - momentum) * running_mean + momentum * mean
        new_running_projection = (1.0 - momentum) * running_projection + momentum * wm
    else:
        mean = running_mean.reshape(G, 1).astype(jnp.float32)
        wm = running_projection.astype(jnp.float32)
        new_running_mean = running_mean
        new_running_projection = running_projection

    # Per-row affine scale/shift (period Cg along K) and folded mean term.
    if weight is not None:
        w_c = weight.reshape(C).astype(jnp.float32)
        b_c = bias.reshape(C).astype(jnp.float32)
    else:
        w_c = jnp.ones((C,), jnp.float32)
        b_c = jnp.zeros((C,), jnp.float32)
    w_kg = jnp.tile(w_c.reshape(Cg, G), (N, 1))               # (K, G)
    b_kg = jnp.tile(b_c.reshape(Cg, G), (N, 1))               # (K, G)
    wm_mean = (wm @ mean).reshape(G)                          # (G,) -> SMEM

    whiten_bytes_per_row = (G * S * (itemsize + 4)            # x block + f32 copy
                            + G * S * (itemsize + 4)          # out block + f32 value
                            + 2 * 128 * 4)                    # lane-padded w/b tiles
    tile_whiten = _pick_tile_k(K, whiten_bytes_per_row, budget)

    out2 = dbn_whiten_affine(x2, w_kg, b_kg, wm, wm_mean, tile_whiten, vmem_limit)
    out = out2.reshape(N, C, H, W)                            # zero-copy view back
    return out, new_running_mean, new_running_projection


# ------------------------------------------------------------------- main ---

if __name__ == "__main__":
    N, C, H, W = 2, 8, 16, 16        # num_features = 8
    G = 4                            # num_groups (must divide num_features)
    eps = 1e-5
    momentum = 0.1

    key = jax.random.PRNGKey(0)
    k1, k2 = jax.random.split(key)
    x = jax.random.normal(k1, (N, C, H, W), dtype=jnp.float32)

    # Deterministic parameter init matching reset_parameters():
    # weight ~ uniform_[0,1), bias = 0, running_mean = 0, running_projection = I
    weight = jax.random.uniform(k2, (1, C, 1, 1), dtype=jnp.float32)
    bias = jnp.zeros((1, C, 1, 1), jnp.float32)
    running_mean = jnp.zeros((G, 1), jnp.float32)
    running_projection = jnp.eye(G, dtype=jnp.float32)

    out, new_rm, new_rp = dbn_forward(
        x, weight, bias, running_mean, running_projection,
        num_groups=G, eps=eps, momentum=momentum, training=True)
    jax.block_until_ready(out)

    # Pure-JAX reference mirroring the PyTorch forward (training branch).
    def ref(inp):
        xr = inp.reshape(N * C // G, G, H, W)
        xr = jnp.transpose(xr, (1, 0, 2, 3)).reshape(G, -1)
        mean = xr.mean(1, keepdims=True)
        xm = xr - mean
        sigma = xm @ xm.T / xr.shape[1] + eps * jnp.eye(G, dtype=xr.dtype)
        eig, u = jnp.linalg.eigh(sigma)
        wm = (u * (eig ** -0.5)[None, :]) @ u.T
        y = wm @ xm
        o = y.reshape(G, N * C // G, H, W).transpose(1, 0, 2, 3).reshape(N, C, H, W)
        return o * weight + bias

    expected = ref(x)
    err = float(jnp.max(jnp.abs(out - expected)))
    assert jnp.allclose(out, expected, atol=1e-3, rtol=1e-3), f"max abs err {err}"
    print("KERNEL_OK")
</pallas_src>

<mosaic_0001>
module attributes {stable_mosaic.version = 11 : i64} {
  func.func @_stats_kernel(%arg0: i32, %arg1: i32, %arg2: memref<4x1024xf32, #tpu.memory_space<vmem>>, %arg3: memref<1x1x4xf32, #tpu.memory_space<vmem>>, %arg4: memref<1x4x4xf32, #tpu.memory_space<vmem>>) attributes {dimension_semantics = [#tpu.dimension_semantics<parallel>, #tpu.dimension_semantics<arbitrary>], iteration_bounds = array<i64: 2, 1>, scalar_prefetch = 0 : i64, scratch_operands = 0 : i64, tpu.core_type = #tpu.core_type<tc>, window_params = [{transform_indices = @transform_0, window_bounds = array<i64: 4, 1024>}, {transform_indices = @transform_1, window_bounds = array<i64: 1, 1, 4>}, {transform_indices = @transform_2, window_bounds = array<i64: 1, 4, 4>}]} {
    %c0_i32 = arith.constant 0 : i32
    %0 = arith.cmpi eq, %arg1, %c0_i32 : i32
    %1 = arith.extui %0 : i1 to i32
    %c0_i32_0 = arith.constant 0 : i32
    %2 = arith.cmpi ne, %1, %c0_i32_0 : i32
    scf.if %2 {
      %cst_29 = arith.constant 0.000000e+00 : f32
      %114 = vector.broadcast %cst_29 : f32 to vector<1x1x4xf32>
      %c0_30 = arith.constant 0 : index
      %c0_31 = arith.constant 0 : index
      %c0_32 = arith.constant 0 : index
      %115 = vector.load %arg3[%c0_30, %c0_31, %c0_32] : memref<1x1x4xf32, #tpu.memory_space<vmem>>, vector<1x1x4xf32>
      tpu.vector_store %arg3[%c0_30, %c0_31, %c0_32], %114 {strides = array<i32>} : memref<1x1x4xf32, #tpu.memory_space<vmem>>, vector<1x1x4xf32>,
      %cst_33 = arith.constant 0.000000e+00 : f32
      %116 = vector.broadcast %cst_33 : f32 to vector<1x4x4xf32>
      %c0_34 = arith.constant 0 : index
      %c0_35 = arith.constant 0 : index
      %c0_36 = arith.constant 0 : index
      %117 = vector.load %arg4[%c0_34, %c0_35, %c0_36] : memref<1x4x4xf32, #tpu.memory_space<vmem>>, vector<1x4x4xf32>
      tpu.vector_store %arg4[%c0_34, %c0_35, %c0_36], %116 {strides = array<i32>} : memref<1x4x4xf32, #tpu.memory_space<vmem>>, vector<1x4x4xf32>,
    } else {
    }
    %c1_i32 = arith.constant 1 : i32
    %3 = arith.muli %arg0, %c1_i32 : i32
    %4 = arith.addi %3, %arg1 : i32
    %c4_i32 = arith.constant 4 : i32
    %5 = arith.muli %4, %c4_i32 : i32
    %6 = tpu.iota {dimensions = array<i32: 0>} : vector<4x1xi32>
    %7 = vector.broadcast %5 : i32 to vector<4x1xi32>
    %8 = arith.addi %7, %6 : vector<4x1xi32>
    %c4_i32_1 = arith.constant 4 : i32
    %9 = vector.broadcast %c4_i32_1 : i32 to vector<4x1xi32>
    %10 = arith.cmpi slt, %8, %9 : vector<4x1xi32>
    %c0 = arith.constant 0 : index
    %c0_2 = arith.constant 0 : index
    %11 = vector.load %arg2[%c0, %c0_2] : memref<4x1024xf32, #tpu.memory_space<vmem>>, vector<4x1024xf32>
    %cst = arith.constant 0.000000e+00 : f32
    %12 = vector.shape_cast %10 : vector<4x1xi1> to vector<4x1xi1>
    %13 = vector.broadcast %12 : vector<4x1xi1> to vector<4x1024xi1>
    %14 = vector.broadcast %cst : f32 to vector<4x1024xf32>
    %15 = arith.select %13, %11, %14 : vector<4x1024xi1>, vector<4x1024xf32>
    %16 = vector.extract_strided_slice %15 {offsets = [0, 0], sizes = [4, 256], strides = [1, 1]} : vector<4x1024xf32> to vector<4x256xf32>
    %17 = vector.extract_strided_slice %15 {offsets = [0, 256], sizes = [4, 256], strides = [1, 1]} : vector<4x1024xf32> to vector<4x256xf32>
    %18 = vector.extract_strided_slice %15 {offsets = [0, 512], sizes = [4, 256], strides = [1, 1]} : vector<4x1024xf32> to vector<4x256xf32>
    %19 = vector.extract_strided_slice %15 {offsets = [0, 768], sizes = [4, 256], strides = [1, 1]} : vector<4x1024xf32> to vector<4x256xf32>
    %20 = vector.shape_cast %16 : vector<4x256xf32> to vector<1x4x256xf32>
    %cst_3 = arith.constant dense<0.000000e+00> : vector<1xf32>
    %21 = vector.multi_reduction <add>, %20, %cst_3 [1, 2] : vector<1x4x256xf32> to vector<1xf32>
    %22 = vector.shape_cast %21 : vector<1xf32> to vector<1x1x1xf32>
    %23 = vector.extract %22[0, 0, 0] : f32 from vector<1x1x1xf32>
    %24 = vector.broadcast %23 : f32 to vector<1x1xf32>
    %25 = vector.shape_cast %17 : vector<4x256xf32> to vector<1x4x256xf32>
    %cst_4 = arith.constant dense<0.000000e+00> : vector<1xf32>
    %26 = vector.multi_reduction <add>, %25, %cst_4 [1, 2] : vector<1x4x256xf32> to vector<1xf32>
    %27 = vector.shape_cast %26 : vector<1xf32> to vector<1x1x1xf32>
    %28 = vector.extract %27[0, 0, 0] : f32 from vector<1x1x1xf32>
    %29 = vector.broadcast %28 : f32 to vector<1x1xf32>
    %30 = vector.shape_cast %18 : vector<4x256xf32> to vector<1x4x256xf32>
    %cst_5 = arith.constant dense<0.000000e+00> : vector<1xf32>
    %31 = vector.multi_reduction <add>, %30, %cst_5 [1, 2] : vector<1x4x256xf32> to vector<1xf32>
    %32 = vector.shape_cast %31 : vector<1xf32> to vector<1x1x1xf32>
    %33 = vector.extract %32[0, 0, 0] : f32 from vector<1x1x1xf32>
    %34 = vector.broadcast %33 : f32 to vector<1x1xf32>
    %35 = vector.shape_cast %19 : vector<4x256xf32> to vector<1x4x256xf32>
    %cst_6 = arith.constant dense<0.000000e+00> : vector<1xf32>
    %36 = vector.multi_reduction <add>, %35, %cst_6 [1, 2] : vector<1x4x256xf32> to vector<1xf32>
    %37 = vector.shape_cast %36 : vector<1xf32> to vector<1x1x1xf32>
    %38 = vector.extract %37[0, 0, 0] : f32 from vector<1x1x1xf32>
    %39 = vector.broadcast %38 : f32 to vector<1x1xf32>
    %c0_7 = arith.constant 0 : index
    %c0_8 = arith.constant 0 : index
    %c0_9 = arith.constant 0 : index
    %40 = vector.load %arg3[%c0_7, %c0_8, %c0_9] : memref<1x1x4xf32, #tpu.memory_space<vmem>>, vector<1x1x4xf32>
    %41 = tpu.concatenate %24, %29, %34, %39 in 1 : vector<1x1xf32>, vector<1x1xf32>, vector<1x1xf32>, vector<1x1xf32> -> vector<1x4xf32>
    %42 = vector.shape_cast %41 : vector<1x4xf32> to vector<1x1x4xf32>
    %43 = arith.addf %40, %42 : vector<1x1x4xf32>
    %c0_10 = arith.constant 0 : index
    %c0_11 = arith.constant 0 : index
    %c0_12 = arith.constant 0 : index
    %44 = vector.load %arg3[%c0_10, %c0_11, %c0_12] : memref<1x1x4xf32, #tpu.memory_space<vmem>>, vector<1x1x4xf32>
    tpu.vector_store %arg3[%c0_10, %c0_11, %c0_12], %43 {strides = array<i32>} : memref<1x1x4xf32, #tpu.memory_space<vmem>>, vector<1x1x4xf32>,
    %45 = arith.mulf %16, %16 : vector<4x256xf32>
    %46 = vector.shape_cast %45 : vector<4x256xf32> to vector<1x4x256xf32>
    %cst_13 = arith.constant dense<0.000000e+00> : vector<1xf32>
    %47 = vector.multi_reduction <add>, %46, %cst_13 [1, 2] : vector<1x4x256xf32> to vector<1xf32>
    %48 = vector.shape_cast %47 : vector<1xf32> to vector<1x1x1xf32>
    %49 = vector.extract %48[0, 0, 0] : f32 from vector<1x1x1xf32>
    %50 = vector.broadcast %49 : f32 to vector<1x1xf32>
    %51 = arith.mulf %16, %17 : vector<4x256xf32>
    %52 = vector.shape_cast %51 : vector<4x256xf32> to vector<1x4x256xf32>
    %cst_14 = arith.constant dense<0.000000e+00> : vector<1xf32>
    %53 = vector.multi_reduction <add>, %52, %cst_14 [1, 2] : vector<1x4x256xf32> to vector<1xf32>
    %54 = vector.shape_cast %53 : vector<1xf32> to vector<1x1x1xf32>
    %55 = vector.extract %54[0, 0, 0] : f32 from vector<1x1x1xf32>
    %56 = vector.broadcast %55 : f32 to vector<1x1xf32>
    %57 = arith.mulf %16, %18 : vector<4x256xf32>
    %58 = vector.shape_cast %57 : vector<4x256xf32> to vector<1x4x256xf32>
    %cst_15 = arith.constant dense<0.000000e+00> : vector<1xf32>
    %59 = vector.multi_reduction <add>, %58, %cst_15 [1, 2] : vector<1x4x256xf32> to vector<1xf32>
    %60 = vector.shape_cast %59 : vector<1xf32> to vector<1x1x1xf32>
    %61 = vector.extract %60[0, 0, 0] : f32 from vector<1x1x1xf32>
    %62 = vector.broadcast %61 : f32 to vector<1x1xf32>
    %63 = arith.mulf %16, %19 : vector<4x256xf32>
    %64 = vector.shape_cast %63 : vector<4x256xf32> to vector<1x4x256xf32>
    %cst_16 = arith.constant dense<0.000000e+00> : vector<1xf32>
    %65 = vector.multi_reduction <add>, %64, %cst_16 [1, 2] : vector<1x4x256xf32> to vector<1xf32>
    %66 = vector.shape_cast %65 : vector<1xf32> to vector<1x1x1xf32>
    %67 = vector.extract %66[0, 0, 0] : f32 from vector<1x1x1xf32>
    %68 = vector.broadcast %67 : f32 to vector<1x1xf32>
    %69 = arith.mulf %17, %17 : vector<4x256xf32>
    %70 = vector.shape_cast %69 : vector<4x256xf32> to vector<1x4x256xf32>
    %cst_17 = arith.constant dense<0.000000e+00> : vector<1xf32>
    %71 = vector.multi_reduction <add>, %70, %cst_17 [1, 2] : vector<1x4x256xf32> to vector<1xf32>
    %72 = vector.shape_cast %71 : vector<1xf32> to vector<1x1x1xf32>
    %73 = vector.extract %72[0, 0, 0] : f32 from vector<1x1x1xf32>
    %74 = vector.broadcast %73 : f32 to vector<1x1xf32>
    %75 = arith.mulf %17, %18 : vector<4x256xf32>
    %76 = vector.shape_cast %75 : vector<4x256xf32> to vector<1x4x256xf32>
    %cst_18 = arith.constant dense<0.000000e+00> : vector<1xf32>
    %77 = vector.multi_reduction <add>, %76, %cst_18 [1, 2] : vector<1x4x256xf32> to vector<1xf32>
    %78 = vector.shape_cast %77 : vector<1xf32> to vector<1x1x1xf32>
    %79 = vector.extract %78[0, 0, 0] : f32 from vector<1x1x1xf32>
    %80 = vector.broadcast %79 : f32 to vector<1x1xf32>
    %81 = arith.mulf %17, %19 : vector<4x256xf32>
    %82 = vector.shape_cast %81 : vector<4x256xf32> to vector<1x4x256xf32>
    %cst_19 = arith.constant dense<0.000000e+00> : vector<1xf32>
    %83 = vector.multi_reduction <add>, %82, %cst_19 [1, 2] : vector<1x4x256xf32> to vector<1xf32>
    %84 = vector.shape_cast %83 : vector<1xf32> to vector<1x1x1xf32>
    %85 = vector.extract %84[0, 0, 0] : f32 from vector<1x1x1xf32>
    %86 = vector.broadcast %85 : f32 to vector<1x1xf32>
    %87 = arith.mulf %18, %18 : vector<4x256xf32>
    %88 = vector.shape_cast %87 : vector<4x256xf32> to vector<1x4x256xf32>
    %cst_20 = arith.constant dense<0.000000e+00> : vector<1xf32>
    %89 = vector.multi_reduction <add>, %88, %cst_20 [1, 2] : vector<1x4x256xf32> to vector<1xf32>
    %90 = vector.shape_cast %89 : vector<1xf32> to vector<1x1x1xf32>
    %91 = vector.extract %90[0, 0, 0] : f32 from vector<1x1x1xf32>
    %92 = vector.broadcast %91 : f32 to vector<1x1xf32>
    %93 = arith.mulf %18, %19 : vector<4x256xf32>
    %94 = vector.shape_cast %93 : vector<4x256xf32> to vector<1x4x256xf32>
    %cst_21 = arith.constant dense<0.000000e+00> : vector<1xf32>
    %95 = vector.multi_reduction <add>, %94, %cst_21 [1, 2] : vector<1x4x256xf32> to vector<1xf32>
    %96 = vector.shape_cast %95 : vector<1xf32> to vector<1x1x1xf32>
    %97 = vector.extract %96[0, 0, 0] : f32 from vector<1x1x1xf32>
    %98 = vector.broadcast %97 : f32 to vector<1x1xf32>
    %99 = arith.mulf %19, %19 : vector<4x256xf32>
    %100 = vector.shape_cast %99 : vector<4x256xf32> to vector<1x4x256xf32>
    %cst_22 = arith.constant dense<0.000000e+00> : vector<1xf32>
    %101 = vector.multi_reduction <add>, %100, %cst_22 [1, 2] : vector<1x4x256xf32> to vector<1xf32>
    %102 = vector.shape_cast %101 : vector<1xf32> to vector<1x1x1xf32>
    %103 = vector.extract %102[0, 0, 0] : f32 from vector<1x1x1xf32>
    %104 = vector.broadcast %103 : f32 to vector<1x1xf32>
    %105 = tpu.concatenate %50, %56, %62, %68 in 1 : vector<1x1xf32>, vector<1x1xf32>, vector<1x1xf32>, vector<1x1xf32> -> vector<1x4xf32>
    %106 = tpu.concatenate %56, %74, %80, %86 in 1 : vector<1x1xf32>, vector<1x1xf32>, vector<1x1xf32>, vector<1x1xf32> -> vector<1x4xf32>
    %107 = tpu.concatenate %62, %80, %92, %98 in 1 : vector<1x1xf32>, vector<1x1xf32>, vector<1x1xf32>, vector<1x1xf32> -> vector<1x4xf32>
    %108 = tpu.concatenate %68, %86, %98, %104 in 1 : vector<1x1xf32>, vector<1x1xf32>, vector<1x1xf32>, vector<1x1xf32> -> vector<1x4xf32>
    %c0_23 = arith.constant 0 : index
    %c0_24 = arith.constant 0 : index
    %c0_25 = arith.constant 0 : index
    %109 = vector.load %arg4[%c0_23, %c0_24, %c0_25] : memref<1x4x4xf32, #tpu.memory_space<vmem>>, vector<1x4x4xf32>
    %110 = tpu.concatenate %105, %106, %107, %108 in 0 : vector<1x4xf32>, vector<1x4xf32>, vector<1x4xf32>, vector<1x4xf32> -> vector<4x4xf32>
    %111 = vector.shape_cast %110 : vector<4x4xf32> to vector<1x4x4xf32>
    %112 = arith.addf %109, %111 : vector<1x4x4xf32>
    %c0_26 = arith.constant 0 : index
    %c0_27 = arith.constant 0 : index
    %c0_28 = arith.constant 0 : index
    %113 = vector.load %arg4[%c0_26, %c0_27, %c0_28] : memref<1x4x4xf32, #tpu.memory_space<vmem>>, vector<1x4x4xf32>
    tpu.vector_store %arg4[%c0_26, %c0_27, %c0_28], %112 {strides = array<i32>} : memref<1x4x4xf32, #tpu.memory_space<vmem>>, vector<1x4x4xf32>,
    return
  }
  func.func @transform_0(%arg0: i32, %arg1: i32) -> (i32, i32) {
    %c1_i32 = arith.constant 1 : i32
    %0 = arith.muli %arg0, %c1_i32 : i32
    %1 = arith.addi %0, %arg1 : i32
    %c0_i32 = arith.constant 0 : i32
    %2 = arith.minsi %1, %c0_i32 : i32
    %c0_i32_0 = arith.constant 0 : i32
    %c0_i32_1 = arith.constant 0 : i32
    return %2, %c0_i32_0 : i32, i32
  }
  func.func @transform_1(%arg0: i32, %arg1: i32) -> (i32, i32, i32) {
    %c0_i32 = arith.constant 0 : i32
    %c0_i32_0 = arith.constant 0 : i32
    %c0_i32_1 = arith.constant 0 : i32
    return %arg0, %c0_i32, %c0_i32_0 : i32, i32, i32
  }
  func.func @transform_2(%arg0: i32, %arg1: i32) -> (i32, i32, i32) {
    %c0_i32 = arith.constant 0 : i32
    %c0_i32_0 = arith.constant 0 : i32
    %c0_i32_1 = arith.constant 0 : i32
    return %arg0, %c0_i32, %c0_i32_0 : i32, i32, i32
  }
}

</mosaic_0001>

<bundles_post_ra>
// kernel: tpu_custom_call.1
= control target key start
LH: loop header
LB: loop body
LE: loop exit
PB: predicated region body
PF: predicated region fallthrough
CT: control target
= control target key end

     0   :  { %8 = vsyncpa [#allocation3], 0  ;;  %s1218_s0 = inlined_call_operand.hbm [shape: f32[4,1024], index: 0, kind: input, shape index: {}]   ;;  %s1219_s1 = inlined_call_operand.hbm [shape: f32[2,1,4], index: 1, kind: output, shape index: {0}]   ;;  %s1220_s2 = inlined_call_operand.hbm [shape: f32[2,4,4], index: 2, kind: output, shape index: {1}]  }
   0x1   :  { %10 = vsyncpa [#allocation3 + $0x1], 0 }
   0x2   :  { %11 = vsyncpa [#allocation4], 0 }
   0x3   :  { %13 = vsyncpa [#allocation4 + $0x1], 0 }
   0x4   :  { %14 = vsyncpa [#allocation7], 0 }
   0x5   :  { %16 = vsyncpa [#allocation7 + $0x1], 0  ;;  %s955_s9 = smov 0   ;;  %s957_s10 = smov 0  }
   0x6   :  { %s959_s11 = smov 0   ;;  %s961_s12 = smov 0  }
   0x7   :  { %s963_s13 = smov 0   ;;  %s965_s14 = smov 0  }
   0x8   :  { %s967_s15 = smov 0   ;;  %s969_s16 = smov 0  }
   0x9 LB: > { %s635_s17 = sadd.s32 4294967295, %s936_s16   ;;  %s636_s18 = sadd.s32 4294967294, %s936_s16   ;;  %s936_s16 = sphi %s969_s16, %s22_s16   ;;  %s932_s15 = sphi %s967_s15, %s1233_s15   ;;  %s928_s14 = sphi %s965_s14, %s1232_s14   ;;  %s924_s13 = sphi %s963_s13, %s1208_s13   ;;  %s920_s12 = sphi %s961_s12, %s1231_s12   ;;  %s916_s11 = sphi %s959_s11, %s1230_s11   ;;  %s912_s10 = sphi %s957_s10, %s1229_s10   ;;  %s908_s9 = sphi %s955_s9, %s1228_s9  }
   0xa   : > { %s34_s19 = sadd.s32 1, %s932_s15  ;;  %p905_p1 = scmp.ne.s32.totalorder %s924_s13, 0 }
   0xb   : > { %p36_p0 = scmp.ge.s32.totalorder %s34_s19, 2  ;;  %p55_p2 = scmp.eq.s32.totalorder %s936_s16, 0 }
   0xc   : > { %p60_p3 = scmp.ne.s32.totalorder %s924_s13, %s920_s12  ;;  %p61_p5 = scmp.eq.s32.totalorder %s635_s17, 0 }
   0xd   : > { %s1235_s19 = smov (%p36_p0, %s34_s19), 0  ;;  %p1001_p4 = por %p905_p1, %p55_p2 }
   0xe   : > { %p1005_p6 = por %p61_p5, %p60_p3  ;;  %s70_s22 = ssub.s32 %s932_s15, %s1235_s19 }
   0xf   : > { %p71_p7 = scmp.eq.s32.totalorder %s70_s22, 0  ;;  %s73_s23 = sadd.s32 1, %s916_s11 }
  0x10   : > { %p83_p8 = scmp.ne.s32.totalorder %s916_s11, %s912_s10  ;;  %p84_p9 = scmp.eq.s32.totalorder %s635_s17, 1 }
  0x11   : > { %s1013_s24 = scalar_select %p71_p7, %s916_s11, %s73_s23  }
  0x12   : > { %p89_p10 = scmp.ne.s32.totalorder %s912_s10, %s908_s9  ;;  %p90_p11 = scmp.eq.s32.totalorder %s636_s18, 1 }
  0x13   : > { %p1019_p12 = por %p84_p9, %p83_p8  ;;  %p638_p13 = scmp.ge.s32.totalorder %s936_s16, 2 }
  0x14   : > { %p1024_p0 = por %p90_p11, %p89_p10  ;;  %p696_p1 = scmp.lt.s32.totalorder %s936_s16, 2 }
  0x15   : > { %s150_s29 = sshll.u32 %s1218_s0, 4  ;;  %s938_s30 = smov [#allocation2]   ;;  %s151_s29 = int_to_ptr.hbm [resolvable:$true] %s150_s29 }
  0x16   : > { %s152_s3 = sshll.u32 %s938_s30, 4  ;;  %p1034_p2 = pnand %p696_p1, %p1001_p4  ;;  %s153_s3 = int_to_ptr.vmem [resolvable:$true] %s152_s3 }
  0x17   : > { %p642_p3 = scmp.ge.s32.totalorder %s936_s16, 1  ;;  %p157_p5 = scmp.lt.s32.totalorder %s936_s16, 3 }
  0x18   : > { %s771_s5 = sshra.s32 %s151_s29, 4  ;;  %p775_p8 = pneg %p1034_p2  ;;  %s772_s5 = int_to_ptr.hbm [resolvable:$true] %s771_s5 }
  0x19   : > { %s773_s6 = scalar_lea.hbm %s772_s5, 32  ;;  %s778_s12 = scalar_lea.hbm %s1218_s0, 32 }
  0x1a   : > { %p774_p7 = scmp.ne.s32.totalorder %s772_s5, %s773_s6  ;;  %p780_p11 = scmp.lt.s32.totalorder %s778_s12, %s773_s6 }
  0x1c   : > { %p776_p9 = pnand %p775_p8, %p774_p7 }
  0x1e   : > { %p777_p10 = pneg %p776_p9 }
  0x20   : > { %p782_p4 = pnand %p780_p11, %p777_p10 }
  0x22   : > { %785 = shalt.err (!%p782_p4)
}
  0x23   : > { %688 = dma.hbm_to_vmem [thread:$0]  (!%p1034_p2), %s151_s29, 512, %s153_s3, [#allocation3]  }
  0x24   : > { %p158_p1 = pnand %p642_p3, %p157_p5 }
  0x25   : > { %s163_s17 = sand.u32 (!%p158_p1), 1, %s924_s13  }
  0x26   : > { %161 = sbr.rel (%p158_p1) target bundleno = 280 (0x118), region = 24  ;;  %s643_s18 = sshll.u32 (!%p158_p1), %s163_s17, 5 }
  0x27   : > { %s164_s20 = scalar_lea.sflag (!%p158_p1), [#allocation3], %s163_s17  ;;  %s167_s22 = scalar_lea.vmem (!%p158_p1), [#allocation2], %s643_s18 }
  0x2b   : > { %894 = dma.done.wait (%p1005_p6), %s164_s20, 512  }
  0x2c   : > { %896 = vsyncadd (%p1005_p6), %s164_s20, 4294966784  ;;  %v206_v0 = vlaneseq  ;;  %s1221_s23 = sshll.u32 %s928_s14, 2  ;;  %v213_v3 = vld [vmem:[%s167_s22 + $0x10] sm:$0xff]  ;;  %v211_v4 = vld [vmem:[%s167_s22] sm:$0xff]  ;;  %vm252_vm1 = vcmask 1043456   ;;  %s1112_s21 = sand.u32 1, %s912_s10  }
  0x2d   : > { %v208_v2 = vstv %s1221_s23  ;;  %v214_v5 = vld [vmem:[%s167_s22 + $0x18] sm:$0xff]  ;;  %225 = vst [vmem:[#allocation1 + $0x20] ss:$2 sm:$0xff] %v213_v3  ;;  %v212_v6 = vld [vmem:[%s167_s22 + $0x8] sm:$0xff]  ;;  %vm200_vm2 = vcmask 24576   ;;  %s1115_s27 = scalar_lea.vmem [#allocation5], %s1112_s21  ;;  %s510_s7 = scalar_lea.hbm %s1219_s1, %s928_s14 }
  0x2e   : > { %v207_v1 = vshrl.u32 %v206_v0, 7  ;;  %221 = vst [vmem:[#allocation1] ss:$2 sm:$0xff] %v211_v4  ;;  %s644_s28 = sshll.u32 %s1112_s21, 2  ;;  %vm202_vm3 = vcmask 27648   ;;  %vm306_vm4 = vcmask 7168  }
  0x2f   : > { %227 = vst [vmem:[#allocation1 + $0x30] ss:$2 sm:$0xff] %v214_v5  ;;  %s1120_s29 = scalar_lea.vmem [#allocation6], %s644_s28  ;;  %vm308_vm5 = vcmask 15360   ;;  %vm310_vm6 = vcmask 23552   ;;  %s512_s12 = sshll.u32 %s1115_s27, 4  ;;  %s513_s12 = int_to_ptr.vmem [resolvable:$true] %s512_s12 }
  0x30   : > { %v209_v7 = vadd.s32 %v208_v2, %v207_v1  ;;  %223 = vst [vmem:[#allocation1 + $0x10] ss:$2 sm:$0xff] %v212_v6  ;;  %s514_s17 = sshll.u32 %s510_s7, 4  ;;  %s821_s7 = scalar_lea.hbm %s1219_s1, 2  ;;  %s515_s17 = int_to_ptr.hbm [resolvable:$true] %s514_s17 }
  0x32   : > { %vm210_vm0 = vcmp.lt.s32.totalorder %v209_v7, 4 }
  0x34   : > { %v232_v8 = vld.sshfl [vmem:[#allocation1 + $0x20] sm:$0xff pattern:$0x75316420]  ;;  %v233_v9 = vld.sshfl [vmem:[#allocation1 + $0x28] sm:$0xff pattern:$0x75316420] }
  0x35   : > { %v1060_v10 = vsel %vm210_vm0, %v232_v8, 0.0  ;;  %v1063_v11 = vsel %vm210_vm0, %v233_v9, 0.0  ;;  %v228_v12 = vld.sshfl [vmem:[#allocation1] sm:$0xff pattern:$0x75316420] }
  0x36   : > { %v279_v13 = vsel %vm252_vm1, %v1060_v10, 0.0  ;;  %v280_v14 = vsel %vm252_vm1, %v1063_v11, 0.0  ;;  %v229_v15 = vld.sshfl [vmem:[#allocation1 + $0x8] sm:$0xff pattern:$0x75316420]  ;;  %v244_v16 = vsel %vm210_vm0, %v228_v12, 0.0  ;;  %v420_v3 = vmul.f32 %v1060_v10, %v1060_v10 }
  0x37   : > { %v281_v17 = vadd.f32 %v280_v14, %v279_v13  ;;  %v245_v18 = vsel %vm210_vm0, %v229_v15, 0.0  ;;  %v253_v19 = vsel %vm252_vm1, %v244_v16, 0.0  ;;  %v315_v20 = vmul.f32 %v244_v16, %v244_v16  ;;  %v234_v21 = vld.sshfl [vmem:[#allocation1 + $0x30] sm:$0xff pattern:$0x75316420] }
  0x38   : > { %v254_v22 = vsel %vm252_vm1, %v245_v18, 0.0  ;;  %v316_v23 = vmul.f32 %v245_v18, %v245_v18  ;;  %v235_v24 = vld.sshfl [vmem:[#allocation1 + $0x38] sm:$0xff pattern:$0x75316420]  ;;  %v250_v25 = vsel %vm210_vm0, %v234_v21, 0.0  ;;  %v345_v47 = vmul.f32 %v1060_v10, %v244_v16 }
  0x39   : > { %282 = vadd.xlane.f32.xlu1 %v281_v17  ;;  %v255_v26 = vadd.f32 %v254_v22, %v253_v19  ;;  %v317_v27 = vsel %vm252_vm1, %v315_v20, 0.0  ;;  %v251_v28 = vsel %vm210_vm0, %v235_v24, 0.0  ;;  %v292_v29 = vsel %vm252_vm1, %v250_v25, 0.0  ;;  %v230_v30 = vld.sshfl [vmem:[#allocation1 + $0x10] sm:$0xff pattern:$0x75316420] }
  0x3a   : > { %v318_v31 = vsel %vm252_vm1, %v316_v23, 0.0  ;;  %v293_v32 = vsel %vm252_vm1, %v251_v28, 0.0  ;;  %v231_v33 = vld.sshfl [vmem:[#allocation1 + $0x18] sm:$0xff pattern:$0x75316420]  ;;  %v246_v34 = vsel %vm210_vm0, %v230_v30, 0.0  ;;  %v360_v44 = vmul.f32 %v250_v25, %v244_v16 }
  0x3b   : > { %256 = vadd.xlane.f32.xlu0 %v255_v26  ;;  %v319_v35 = vadd.f32 %v318_v31, %v317_v27  ;;  %v247_v36 = vsel %vm210_vm0, %v231_v33, 0.0  ;;  %v266_v37 = vsel %vm252_vm1, %v246_v34, 0.0  ;;  %v330_v39 = vmul.f32 %v246_v34, %v244_v16 }
  0x3c   : > { %v267_v38 = vsel %vm252_vm1, %v247_v36, 0.0  ;;  %v331_v40 = vmul.f32 %v247_v36, %v245_v18  ;;  %v294_v41 = vadd.f32 %v293_v32, %v292_v29  ;;  %v361_v45 = vmul.f32 %v251_v28, %v245_v18 }
  0x3d   : > { %320 = vadd.xlane.f32.xlu2 %v319_v35  ;;  %v332_v42 = vsel %vm252_vm1, %v330_v39, 0.0  ;;  %v268_v46 = vadd.f32 %v267_v38, %v266_v37  ;;  %v346_v48 = vmul.f32 %v1063_v11, %v245_v18  ;;  %v362_v50 = vsel %vm252_vm1, %v360_v44, 0.0 }
  0x3e   : > { %v333_v43 = vsel %vm252_vm1, %v331_v40, 0.0  ;;  %v363_v51 = vsel %vm252_vm1, %v361_v45, 0.0  ;;  %v375_v52 = vmul.f32 %v246_v34, %v246_v34  ;;  %v376_v53 = vmul.f32 %v247_v36, %v247_v36 }
  0x3f   : > { %v334_v49 = vadd.f32 %v333_v43, %v332_v42  ;;  %v347_v54 = vsel %vm252_vm1, %v345_v47, 0.0  ;;  %v348_v55 = vsel %vm252_vm1, %v346_v48, 0.0  ;;  %v364_v56 = vadd.f32 %v363_v51, %v362_v50 }
  0x40   : > { %v377_v57 = vsel %vm252_vm1, %v375_v52, 0.0  ;;  %v378_v58 = vsel %vm252_vm1, %v376_v53, 0.0  ;;  %v405_v59 = vmul.f32 %v250_v25, %v246_v34  ;;  %v406_v60 = vmul.f32 %v251_v28, %v247_v36 }
  0x41   : > { %295 = vadd.xlane.f32.xlu1 %v294_v41  ;;  %v349_v61 = vadd.f32 %v348_v55, %v347_v54  ;;  %v390_v62 = vmul.f32 %v1060_v10, %v246_v34  ;;  %v391_v63 = vmul.f32 %v1063_v11, %v247_v36  ;;  %v379_v0 = vadd.f32 %v378_v58, %v377_v57 }
  0x42   : > { %v407_v1 = vsel %vm252_vm1, %v405_v59, 0.0  ;;  %v408_v2 = vsel %vm252_vm1, %v406_v60, 0.0  ;;  %v421_v4 = vmul.f32 %v1063_v11, %v1063_v11  ;;  %v422_v8 = vsel %vm252_vm1, %v420_v3, 0.0 }
  0x43   : > { %269 = vadd.xlane.f32.xlu0 %v268_v46  ;;  %v392_v5 = vsel %vm252_vm1, %v390_v62, 0.0  ;;  %v393_v6 = vsel %vm252_vm1, %v391_v63, 0.0  ;;  %v409_v7 = vadd.f32 %v408_v2, %v407_v1  ;;  %v450_v12 = vmul.f32 %v250_v25, %v250_v25 }
  0x44   : > { %v423_v9 = vsel %vm252_vm1, %v421_v4, 0.0  ;;  %v451_v13 = vmul.f32 %v251_v28, %v251_v28  ;;  %v394_v14 = vadd.f32 %v393_v6, %v392_v5  ;;  %v435_v15 = vmul.f32 %v250_v25, %v1060_v10 }
  0x45   : > { %335 = vadd.xlane.f32.xlu2 %v334_v49  ;;  %v436_v16 = vmul.f32 %v251_v28, %v1063_v11  ;;  %v424_v17 = vadd.f32 %v423_v9, %v422_v8  ;;  %v452_v18 = vsel %vm252_vm1, %v450_v12, 0.0 }
  0x46   : > { %v453_v19 = vsel %vm252_vm1, %v451_v13, 0.0  ;;  %v437_v20 = vsel %vm252_vm1, %v435_v15, 0.0 }
  0x47   : > { %v438_v21 = vsel %vm252_vm1, %v436_v16, 0.0  ;;  %v454_v22 = vadd.f32 %v453_v19, %v452_v18 }
  0x48   : > { %v439_v23 = vadd.f32 %v438_v21, %v437_v20 }
  0x49   : > { %365 = vadd.xlane.f32.xlu1 %v364_v56 }
  0x4b   : > { %350 = vadd.xlane.f32.xlu0 %v349_v61 }
  0x4d   : > { %380 = vadd.xlane.f32.xlu2 %v379_v0 }
  0x51   : > { %410 = vadd.xlane.f32.xlu1 %v409_v7 }
  0x53   : > { %395 = vadd.xlane.f32.xlu0 %v394_v14 }
  0x55   : > { %425 = vadd.xlane.f32.xlu2 %v424_v17 }
  0x59   : > { %455 = vadd.xlane.f32.xlu1 %v454_v22 }
  0x5b   : > { %440 = vadd.xlane.f32.xlu0 %v439_v23 }
  0xac   : > { %v283_v24 = vpop.xlane.xlu1 %282 }
  0xad   : > { %v284_v10 = vrot.slane %v283_v24, 4 }
  0xae   : > { %v257_v25 = vpop.xlane.xlu0 %256 }
  0xaf   : > { %v258_v11 = vrot.slane %v257_v25, 4  ;;  %v285_v29 = vadd.f32 %v284_v10, %v283_v24 }
  0xb0   : > { %v321_v26 = vpop.xlane.xlu2 %320 }
  0xb1   : > { %v259_v27 = vadd.f32 %v258_v11, %v257_v25  ;;  %v322_v28 = vrot.slane %v321_v26, 4  ;;  %v286_v35 = vrot.slane %v285_v29, 2 }
  0xb3   : > { %v260_v30 = vrot.slane %v259_v27, 2  ;;  %v323_v31 = vadd.f32 %v322_v28, %v321_v26  ;;  %v287_v46 = vadd.f32 %v286_v35, %v285_v29 }
  0xb4   : > { %v296_v32 = vpop.xlane.xlu1 %295 }
  0xb5   : > { %v297_v33 = vrot.slane %v296_v32, 4  ;;  %v261_v34 = vadd.f32 %v260_v30, %v259_v27  ;;  %v324_v40 = vrot.slane %v323_v31, 2  ;;  %v288_v57 = vrot.slane %v287_v46, 1 }
  0xb6   : > { %v270_v36 = vpop.xlane.xlu0 %269 }
  0xb7   : > { %v298_v37 = vadd.f32 %v297_v33, %v296_v32  ;;  %v271_v38 = vrot.slane %v270_v36, 4  ;;  %v262_v39 = vrot.slane %v261_v34, 1  ;;  %v325_v51 = vadd.f32 %v324_v40, %v323_v31 }
  0xb8   : > { %v336_v41 = vpop.xlane.xlu2 %335  ;;  %v289_v5 = vadd.f32 %v288_v57, %v287_v46 }
  0xb9   : > { %v299_v42 = vrot.slane %v298_v37, 2  ;;  %v272_v43 = vadd.f32 %v271_v38, %v270_v36  ;;  %v337_v44 = vrot.slane %v336_v41, 4  ;;  %v263_v45 = vadd.f32 %v262_v39, %v261_v34 }
  0xba   : > { %v326_v63 = vrot.slane %v325_v51, 1 }
  0xbb   : > { %v273_v47 = vrot.slane %v272_v43, 2  ;;  %v338_v48 = vadd.f32 %v337_v44, %v336_v41  ;;  %651 = vpush %v263_v45  ;;  %v300_v49 = vadd.f32 %v299_v42, %v298_v37 }
  0xbc   : > { %v366_v50 = vpop.xlane.xlu1 %365  ;;  %v327_v12 = vadd.f32 %v326_v63, %v325_v51 }
  0xbd   : > { %v339_v52 = vrot.slane %v338_v48, 2  ;;  %v367_v53 = vrot.slane %v366_v50, 4  ;;  %v274_v54 = vadd.f32 %v273_v47, %v272_v43  ;;  %v301_v55 = vrot.slane %v300_v49, 1 }
  0xbe   : > { %v351_v56 = vpop.xlane.xlu0 %350 }
  0xbf   : > { %v368_v58 = vadd.f32 %v367_v53, %v366_v50  ;;  %v352_v59 = vrot.slane %v351_v56, 4  ;;  %v275_v60 = vrot.slane %v274_v54, 1  ;;  %v302_v62 = vadd.f32 %v301_v55, %v300_v49 }
  0xc0   : > { %v381_v61 = vpop.xlane.xlu2 %380  ;;  %v340_v0 = vadd.f32 %v339_v52, %v338_v48  ;;  %v939_v53 = vmov 0.0  }
  0xc1   : > { %v369_v1 = vrot.slane %v368_v58, 2  ;;  %v353_v2 = vadd.f32 %v352_v59, %v351_v56  ;;  %v382_v3 = vrot.slane %v381_v61, 4  ;;  %v276_v4 = vadd.f32 %v275_v60, %v274_v54  ;;  %201 = vst.msk [vmem:[%s1115_s27] sm:$0x1] %vm200_vm2, %v939_v53 }
  0xc2   : > { %v341_v6 = vrot.slane %v340_v0, 1  ;;  %203 = vst.msk [vmem:[%s1120_s29] sm:$0xf] %vm202_vm3, %v939_v53 }
  0xc3   : > { %v354_v7 = vrot.slane %v353_v2, 2  ;;  %v383_v8 = vadd.f32 %v382_v3, %v381_v61  ;;  %653 = vpush %v276_v4  ;;  %v370_v9 = vadd.f32 %v369_v1, %v368_v58 }
  0xc4   : > { %655 = vpush %v289_v5  ;;  %v342_v13 = vadd.f32 %v341_v6, %v340_v0  ;;  %v411_v14 = vpop.xlane.xlu1 %410 }
  0xc5   : > { %v384_v15 = vrot.slane %v383_v8, 2  ;;  %657 = vpush %v302_v62  ;;  %v412_v16 = vrot.slane %v411_v14, 4  ;;  %v355_v17 = vadd.f32 %v354_v7, %v353_v2  ;;  %v371_v18 = vrot.slane %v370_v9, 1 }
  0xc6   : > { %659 = vpush %v327_v12  ;;  %v396_v19 = vpop.xlane.xlu0 %395 }
  0xc7   : > { %661 = vpush %v342_v13  ;;  %v413_v20 = vadd.f32 %v412_v16, %v411_v14  ;;  %v397_v21 = vrot.slane %v396_v19, 4  ;;  %v356_v22 = vrot.slane %v355_v17, 1  ;;  %v372_v24 = vadd.f32 %v371_v18, %v370_v9 }
  0xc8   : > { %v426_v23 = vpop.xlane.xlu2 %425  ;;  %v385_v10 = vadd.f32 %v384_v15, %v383_v8  ;;  %v305_v61 = vld [vmem:[%s1115_s27] sm:$0x1] }
  0xc9   : > { %v414_v25 = vrot.slane %v413_v20, 2  ;;  %v398_v11 = vadd.f32 %v397_v21, %v396_v19  ;;  %v427_v26 = vrot.slane %v426_v23, 4  ;;  %v357_v27 = vadd.f32 %v356_v22, %v355_v17 }
  0xca   : > { %v386_v28 = vrot.slane %v385_v10, 1 }
  0xcb   : > { %v399_v29 = vrot.slane %v398_v11, 2  ;;  %v428_v30 = vadd.f32 %v427_v26, %v426_v23  ;;  %663 = vpush %v357_v27  ;;  %v415_v31 = vadd.f32 %v414_v25, %v413_v20 }
  0xcc   : > { %665 = vpush %v372_v24  ;;  %v387_v32 = vadd.f32 %v386_v28, %v385_v10  ;;  %v456_v33 = vpop.xlane.xlu1 %455 }
  0xcd   : > { %v429_v34 = vrot.slane %v428_v30, 2  ;;  %v457_v35 = vrot.slane %v456_v33, 4  ;;  %v400_v36 = vadd.f32 %v399_v29, %v398_v11  ;;  %v416_v37 = vrot.slane %v415_v31, 1 }
  0xce   : > { %667 = vpush %v387_v32  ;;  %v441_v38 = vpop.xlane.xlu0 %440 }
  0xcf   : > { %v430_v39 = vadd.f32 %v429_v34, %v428_v30  ;;  %v458_v40 = vadd.f32 %v457_v35, %v456_v33  ;;  %v442_v41 = vrot.slane %v441_v38, 4  ;;  %v401_v42 = vrot.slane %v400_v36, 1 }
  0xd0   : > { %v417_v43 = vadd.f32 %v416_v37, %v415_v31 }
  0xd1   : > { %v459_v44 = vrot.slane %v458_v40, 2  ;;  %v443_v45 = vadd.f32 %v442_v41, %v441_v38  ;;  %v402_v46 = vadd.f32 %v401_v42, %v400_v36  ;;  %v431_v47 = vrot.slane %v430_v39, 1 }
  0xd3   : > { %v460_v48 = vadd.f32 %v459_v44, %v458_v40  ;;  %v444_v49 = vrot.slane %v443_v45, 2  ;;  %669 = vpush %v402_v46  ;;  %v432_v50 = vadd.f32 %v431_v47, %v430_v39 }
  0xd4   : > { %671 = vpush %v417_v43 }
  0xd5   : > { %v445_v51 = vadd.f32 %v444_v49, %v443_v45  ;;  %673 = vpush %v432_v50  ;;  %v461_v52 = vrot.slane %v460_v48, 1 }
  0xd7   : > { %v446_v54 = vrot.slane %v445_v51, 1  ;;  %v462_v55 = vadd.f32 %v461_v52, %v460_v48 }
  0xd9   : > { %v447_v56 = vadd.f32 %v446_v54, %v445_v51 }
  0xdb   : > { %675 = vpush %v447_v56 }
  0xdc   : > { %677 = vpush %v462_v55 }
  0xec   : > { %s652_s30 = spop %651 }
  0xed   : > { %v265_v57 = vstv %s652_s30  ;;  %s497_s30 = scalar_lea.sflag [#allocation4], %s1112_s21 }
  0xf4   : > { %s654_s3 = spop %653 }
  0xf5   : > { %v278_v58 = vstv %s654_s3  ;;  %s656_s4 = spop %655  ;;  %s815_s3 = sshra.s32 %s515_s17, 4  ;;  %s816_s3 = int_to_ptr.hbm [resolvable:$true] %s815_s3 }
  0xf6   : > { %v307_v59 = vsel %vm306_vm4, %v265_v57, %v278_v58  ;;  %v291_v60 = vstv %s656_s4  ;;  %s658_s8 = spop %657  ;;  %s817_s4 = scalar_lea.hbm %s816_s3, 1 }
  0xf7   : > { %v309_v62 = vsel %vm308_vm5, %v307_v59, %v291_v60  ;;  %v304_v63 = vstv %s658_s8  ;;  %s1133_s18 = spop %659  ;;  %p818_p6 = scmp.ne.s32.totalorder %s816_s3, %s817_s4 }
  0xf8   : > { %v311_v0 = vsel %vm310_vm6, %v309_v62, %v304_v63  ;;  %s1137_s20 = spop %661  ;;  %p822_p5 = scmp.lt.s32.totalorder %s816_s3, %s1219_s1 }
  0xf9   : > { %v312_v1 = vadd.f32 %v311_v0, %v305_v61  ;;  %p819_p2 = pnand %p818_p6, %p1019_p12  ;;  %p823_p7 = scmp.lt.s32.totalorder %s821_s7, %s817_s4 }
  0xfb   : > { %314 = vst.msk [vmem:[%s1115_s27] sm:$0x1] %vm200_vm2, %v312_v1  ;;  %p820_p3 = pneg %p819_p2  ;;  %p824_p8 = por %p823_p7, %p822_p5 }
  0xfc   : > { %s1139_s22 = spop %663 }
  0xfd   : > { %s1141_s28 = spop %665  ;;  %p825_p9 = pnand %p824_p8, %p820_p3 }
  0xff   : > { %828 = shalt.err (!%p825_p9)
}
 0x100   : > { %681 = dma.vmem_to_hbm [thread:$0]  (%p1019_p12), %s513_s12, 16, %s515_s17, %s497_s30   ;;  %v344_v3 = vstv %s1137_s20  ;;  %v359_v8 = vstv %s1139_s22  ;;  %v329_v12 = vstv %s1133_s18  ;;  %v374_v17 = vstv %s1141_s28 }
 0x101   : > { %s668_s23 = spop %667  ;;  %v465_v15 = vsel %vm306_vm4, %v329_v12, %v344_v3  ;;  %vm487_vm7 = vcmask 1040384   ;;  %s1227_s17 = sshll.u32 %s928_s14, 2  ;;  %vm489_vm8 = vcmask 1041408   ;;  %vm491_vm9 = vcmask 1042432   ;;  %v477_v27 = vld [vmem:[%s1120_s29] sm:$0xf] }
 0x102   : > { %v389_v2 = vstv %s668_s23  ;;  %v466_v16 = vsel %vm308_vm5, %v465_v15, %v359_v8  ;;  %s524_s22 = scalar_lea.hbm %s1220_s2, %s1227_s17  ;;  %s526_s14 = sshll.u32 %s1120_s29, 4  ;;  %s527_s14 = int_to_ptr.vmem [resolvable:$true] %s526_s14 }
 0x103   : > { %v468_v4 = vsel %vm306_vm4, %v344_v3, %v389_v2  ;;  %v467_v10 = vsel %vm310_vm6, %v466_v16, %v374_v17  ;;  %s528_s28 = sshll.u32 %s524_s22, 4  ;;  %s501_s30 = scalar_lea.sflag [#allocation7], %s1112_s21  ;;  %s529_s28 = int_to_ptr.hbm [resolvable:$true] %s528_s28 }
 0x104   : > { %s670_s5 = spop %669  ;;  %s843_s4 = sshra.s32 %s529_s28, 4  ;;  %s844_s4 = int_to_ptr.hbm [resolvable:$true] %s843_s4 }
 0x105   : > { %v404_v5 = vstv %s670_s5  ;;  %s672_s6 = spop %671  ;;  %s845_s7 = scalar_lea.hbm %s844_s4, 4 }
 0x106   : > { %v469_v6 = vsel %vm308_vm5, %v468_v4, %v404_v5  ;;  %v419_v7 = vstv %s672_s6  ;;  %s674_s3 = spop %673  ;;  %v471_v13 = vsel %vm306_vm4, %v359_v8, %v404_v5  ;;  %p846_p10 = scmp.ne.s32.totalorder %s844_s4, %s845_s7 }
 0x107   : > { %v470_v9 = vsel %vm310_vm6, %v469_v6, %v419_v7  ;;  %v434_v14 = vstv %s674_s3  ;;  %v474_v19 = vsel %vm306_vm4, %v374_v17, %v419_v7  ;;  %s849_s5 = scalar_lea.hbm %s1220_s2, 8  ;;  %p850_p1 = scmp.lt.s32.totalorder %s844_s4, %s1220_s2 }
 0x108   : > { %v479_v18 = vrot.slane %v470_v9, 7  ;;  %v472_v20 = vsel %vm308_vm5, %v471_v13, %v434_v14  ;;  %p847_p11 = pnand %p846_p10, %p1019_p12  ;;  %p851_p6 = scmp.lt.s32.totalorder %s849_s5, %s845_s7 }
 0x10a   : > { %v488_v26 = vsel %vm487_vm7, %v467_v10, %v479_v18  ;;  %p848_p4 = pneg %p847_p11  ;;  %p852_p2 = por %p851_p6, %p850_p1 }
 0x10c   : > { %s676_s23 = spop %675  ;;  %p853_p3 = pnand %p852_p2, %p848_p4 }
 0x10d   : > { %v449_v21 = vstv %s676_s23  ;;  %s678_s12 = spop %677 }
 0x10e   : > { %v473_v22 = vsel %vm310_vm6, %v472_v20, %v449_v21  ;;  %v475_v23 = vsel %vm308_vm5, %v474_v19, %v449_v21  ;;  %v464_v24 = vstv %s678_s12 }
 0x10f   : > { %v482_v25 = vrot.slane %v473_v22, 6  ;;  %v476_v11 = vsel %vm310_vm6, %v475_v23, %v464_v24 }
 0x110   : > { %v485_v28 = vrot.slane %v476_v11, 5 }
 0x111   : > { %v490_v29 = vsel %vm489_vm8, %v488_v26, %v482_v25 }
 0x112   : > { %v492_v30 = vsel %vm491_vm9, %v490_v29, %v485_v28 }
 0x113   : > { %v493_v31 = vadd.f32 %v492_v30, %v477_v27 }
 0x115   : > { %495 = vst.msk [vmem:[%s1120_s29] sm:$0xf] %vm202_vm3, %v493_v31 }
 0x116   : > { %856 = shalt.err (!%p853_p3)
}
 0x117   : > { %682 = dma.vmem_to_hbm [thread:$0]  (%p1019_p12), %s527_s14, 64, %s529_s28, %s501_s30  }
 0x118 PF: > { %s540_s21 = sand.u32 1, %s908_s9   ;;  %p690_p5 = pnand %p638_p13, %p1024_p0 }
 0x119   : > { %s541_s29 = scalar_lea.sflag [#allocation4], %s540_s21 }
 0x11a   : > { %p691_p7 = pneg %p690_p5 }
 0x11c   : > { %898 = dma.done.wait (%p691_p7), %s541_s29, 16  }
 0x11d   : > { %900 = vsyncadd (%p691_p7), %s541_s29, 4294967280  ;;  %s550_s23 = scalar_lea.sflag [#allocation7], %s540_s21 }
 0x11e   : > { %902 = dma.done.wait (%p691_p7), %s550_s23, 64  }
 0x11f   : > { %904 = vsyncadd (%p691_p7), %s550_s23, 4294967232  ;;  %s22_s16 = sadd.s32 1, %s936_s16   ;;  %s1228_s9 = smov %s912_s10 }
 0x120   : > { %p19_p8 = scmp.ge.s32.totalorder %s22_s16, 4   ;;  %s1229_s10 = smov %s916_s11 }
 0x121   : > { %s1230_s11 = smov %s1013_s24  ;;  %s1231_s12 = smov %s924_s13 }
 0x122   : > { %s1208_s13 = smov 0   ;;  %s1232_s14 = smov %s932_s15 }
 0x123   : > { %s1233_s15 = smov %s1235_s19  ;;  %21 = sbr.rel (!%p19_p8) target bundleno = 9 (0x9), region = 93 }
 0x128   :  { %556 = vsyncpa [#allocation3], 1 }
 0x129   :  { %558 = vsyncpa [#allocation3 + $0x1], 1 }
 0x12a   :  { %559 = vsyncpa [#allocation4], 1 }
 0x12b   :  { %561 = vsyncpa [#allocation4 + $0x1], 1 }
 0x12c   :  { %562 = vsyncpa [#allocation7], 1 }
 0x12d   :  { %564 = vsyncpa [#allocation7 + $0x1], 1 }

</bundles_post_ra>
